<compile_context>
chip_gen: v5e
topology: v5e:2x2
jax: 0.10.0
libtpu: 0.0.40
codegen_flags: <defaults>
</compile_context>

<pallas_src>
import functools

import jax
import jax.numpy as jnp
from jax.experimental import pallas as pl
from jax.experimental.pallas import tpu as pltpu

_EPS = 1e-6  # matches torch.nn.functional.pairwise_distance default eps


def _triplet_loss_kernel(a_ref, p_ref, n_ref, out_ref, *,
                         margin, batch, tile_b, inner_tiles, num_tiles,
                         needs_mask):
    c = pl.program_id(0)   # chunk axis (megacore on v7x; size 1 elsewhere)
    i = pl.program_id(1)   # inner reduction over this chunk's batch tiles

    # out_ref's block index is constant over i -> it stays resident in VMEM
    # and acts as the accumulator (no SMEM scalar round trip per step).
    @pl.when(i == 0)
    def _():
        out_ref[...] = jnp.zeros_like(out_ref)

    a = a_ref[...].astype(jnp.float32)
    p = p_ref[...].astype(jnp.float32)
    n = n_ref[...].astype(jnp.float32)

    # F.pairwise_distance(x1, x2, p=2, eps=1e-6) = ||x1 - x2 + eps||_2 over D
    diff_p = a - p + _EPS
    diff_n = a - n + _EPS
    dist_p = jnp.sqrt(jnp.sum(diff_p * diff_p, axis=-1, keepdims=True))  # (TB,1)
    dist_n = jnp.sqrt(jnp.sum(diff_n * diff_n, axis=-1, keepdims=True))  # (TB,1)

    losses = jnp.maximum(dist_p - dist_n + margin, 0.0)                  # (TB,1)

    if needs_mask:
        # Only the very last logical tile can straddle the batch boundary
        # (tiles are contiguous and never clamped), so gate the mask there.
        tile_idx = c * inner_tiles + i
        is_tail = tile_idx == num_tiles - 1

        @pl.when(jnp.logical_not(is_tail))
        def _():
            out_ref[...] += jnp.sum(losses)

        @pl.when(is_tail)
        def _():
            row0 = tile_idx * tile_b
            rows = row0 + jax.lax.broadcasted_iota(jnp.int32, losses.shape, 0)
            out_ref[...] += jnp.sum(jnp.where(rows < batch, losses, 0.0))
    else:
        out_ref[...] += jnp.sum(losses)


def _device_kind():
    try:
        return jax.devices()[0].device_kind.lower()
    except Exception:
        return ""


def triplet_loss(anchor, positive, negative, margin=1.0, *, tile_b=None):
    """Pallas TPU implementation of TripletLoss.forward. Returns a scalar f32."""
    assert anchor.shape == positive.shape == negative.shape
    assert anchor.ndim == 2, "expected (batch, embedding_dim) inputs"
    B, D = anchor.shape

    dtype = jnp.dtype(anchor.dtype)
    itemsize = dtype.itemsize
    sublane = max(8, 32 // itemsize)          # 8 f32, 16 bf16, 32 int8/fp8
    b_pad = ((B + sublane - 1) // sublane) * sublane

    if tile_b is None:
        # Bytes-per-step sizing: ~4 MiB per input per pipeline step.
        # 3 inputs x 2 pipeline buffers x 4 MiB = ~24 MiB, safe on every
        # generation (v7x has only 64 MiB physical VMEM per TensorCore) while
        # keeping the fixed ~0.35 us grid-step overhead negligible.
        target_bytes = 4 * 1024 * 1024
        rows_fit = max(sublane, target_bytes // (D * itemsize))
        tile_b = min(rows_fit, b_pad)
    tile_b = max(sublane, (min(tile_b, b_pad) // sublane) * sublane)
    # TODO(synk): for extremely large D (one sublane of rows already exceeds
    # the VMEM budget) add an inner D-tiling reduction.

    num_tiles = pl.cdiv(B, tile_b)

    # 2-way split only on v7x (2 TensorCores/chip) and only when tiles divide
    # evenly, so no grid step re-reads a clamped/duplicated tile.
    kind = _device_kind()
    is_v7x = ("v7" in kind) or ("7x" in kind)
    num_chunks = 2 if (is_v7x and num_tiles >= 2 and num_tiles % 2 == 0) else 1
    inner_tiles = num_tiles // num_chunks

    needs_mask = (num_tiles * tile_b) > B

    kernel = functools.partial(
        _triplet_loss_kernel,
        margin=float(margin), batch=B, tile_b=tile_b,
        inner_tiles=inner_tiles, num_tiles=num_tiles, needs_mask=needs_mask)

    def in_map(c, i):
        # Contiguous, non-overlapping, never-clamped tiles.
        return (c * inner_tiles + i, 0)

    in_spec = pl.BlockSpec((tile_b, D), in_map)

    partials = pl.pallas_call(
        kernel,
        out_shape=jax.ShapeDtypeStruct((num_chunks * 8, 128), jnp.float32),
        grid_spec=pltpu.PrefetchScalarGridSpec(
            num_scalar_prefetch=0,
            grid=(num_chunks, inner_tiles),
            in_specs=[in_spec, in_spec, in_spec],
            out_specs=pl.BlockSpec((8, 128), lambda c, i: (c, 0)),
        ),
        compiler_params=pltpu.CompilerParams(
            dimension_semantics=("parallel", "arbitrary"),
            vmem_limit_bytes=48 * 1024 * 1024,
        ),
    )(anchor, positive, negative)

    # Every element of chunk c's (8,128) block equals that chunk's partial sum.
    return partials.reshape(num_chunks, 8, 128)[:, 0, 0].sum() / B


if __name__ == "__main__":
    key = jax.random.PRNGKey(0)
    k_a, k_p, k_n = jax.random.split(key, 3)

    B, D = 20, 256  # B deliberately not a multiple of the tile to exercise masking
    anchor = jax.random.normal(k_a, (B, D), dtype=jnp.float32)
    positive = jax.random.normal(k_p, (B, D), dtype=jnp.float32)
    negative = jax.random.normal(k_n, (B, D), dtype=jnp.float32)

    # Pure-JAX reference (same math as the PyTorch module).
    dp = jnp.sqrt(jnp.sum((anchor - positive + _EPS) ** 2, axis=-1))
    dn = jnp.sqrt(jnp.sum((anchor - negative + _EPS) ** 2, axis=-1))
    ref = jnp.mean(jnp.maximum(dp - dn + 1.0, 0.0))

    # 1) Small forced tile: multi-step inner reduction + straddling-tile mask.
    loss_tiled = triplet_loss(anchor, positive, negative, margin=1.0, tile_b=8)
    jax.block_until_ready(loss_tiled)
    assert jnp.allclose(loss_tiled, ref, rtol=1e-5, atol=1e-5), (loss_tiled, ref)

    # 2) Default (bytes-budget-driven) tile size — single padded tile.
    loss = triplet_loss(anchor, positive, negative, margin=1.0)
    jax.block_until_ready(loss)
    assert jnp.allclose(loss, ref, rtol=1e-5, atol=1e-5), (loss, ref)

    print("KERNEL_OK")
</pallas_src>

<mosaic_0001>
module attributes {stable_mosaic.version = 11 : i64} {
  func.func @_triplet_loss_kernel(%arg0: i32, %arg1: i32, %arg2: memref<8x256xf32, #tpu.memory_space<vmem>>, %arg3: memref<8x256xf32, #tpu.memory_space<vmem>>, %arg4: memref<8x256xf32, #tpu.memory_space<vmem>>, %arg5: memref<8x128xf32, #tpu.memory_space<vmem>>) attributes {dimension_semantics = [#tpu.dimension_semantics<parallel>, #tpu.dimension_semantics<arbitrary>], iteration_bounds = array<i64: 1, 3>, scalar_prefetch = 0 : i64, scratch_operands = 0 : i64, tpu.core_type = #tpu.core_type<tc>, window_params = [{transform_indices = @transform_0, window_bounds = array<i64: 8, 256>}, {transform_indices = @transform_1, window_bounds = array<i64: 8, 256>}, {transform_indices = @transform_2, window_bounds = array<i64: 8, 256>}, {transform_indices = @transform_3, window_bounds = array<i64: 8, 128>}]} {
    %c0_i32 = arith.constant 0 : i32
    %0 = arith.cmpi eq, %arg1, %c0_i32 : i32
    %1 = arith.extui %0 : i1 to i32
    %c0_i32_0 = arith.constant 0 : i32
    %2 = arith.cmpi ne, %1, %c0_i32_0 : i32
    scf.if %2 {
      %cst_13 = arith.constant 0.000000e+00 : f32
      %33 = vector.broadcast %cst_13 : f32 to vector<8x128xf32>
      %c0_14 = arith.constant 0 : index
      %c0_15 = arith.constant 0 : index
      %34 = vector.load %arg5[%c0_14, %c0_15] : memref<8x128xf32, #tpu.memory_space<vmem>>, vector<8x128xf32>
      tpu.vector_store %arg5[%c0_14, %c0_15], %33 {strides = array<i32>} : memref<8x128xf32, #tpu.memory_space<vmem>>, vector<8x128xf32>,
    } else {
    }
    %c0 = arith.constant 0 : index
    %c0_1 = arith.constant 0 : index
    %3 = vector.load %arg2[%c0, %c0_1] : memref<8x256xf32, #tpu.memory_space<vmem>>, vector<8x256xf32>
    %c0_2 = arith.constant 0 : index
    %c0_3 = arith.constant 0 : index
    %4 = vector.load %arg3[%c0_2, %c0_3] : memref<8x256xf32, #tpu.memory_space<vmem>>, vector<8x256xf32>
    %c0_4 = arith.constant 0 : index
    %c0_5 = arith.constant 0 : index
    %5 = vector.load %arg4[%c0_4, %c0_5] : memref<8x256xf32, #tpu.memory_space<vmem>>, vector<8x256xf32>
    %6 = arith.subf %3, %4 : vector<8x256xf32>
    %cst = arith.constant 9.99999997E-7 : f32
    %7 = vector.broadcast %cst : f32 to vector<8x256xf32>
    %8 = arith.addf %6, %7 : vector<8x256xf32>
    %9 = arith.subf %3, %5 : vector<8x256xf32>
    %cst_6 = arith.constant 9.99999997E-7 : f32
    %10 = vector.broadcast %cst_6 : f32 to vector<8x256xf32>
    %11 = arith.addf %9, %10 : vector<8x256xf32>
    %12 = arith.mulf %8, %8 : vector<8x256xf32>
    %cst_7 = arith.constant dense<0.000000e+00> : vector<8xf32>
    %13 = vector.multi_reduction <add>, %12, %cst_7 [1] : vector<8x256xf32> to vector<8xf32>
    %14 = vector.shape_cast %13 : vector<8xf32> to vector<8x1xf32>
    %15 = math.sqrt %14 : vector<8x1xf32>
    %16 = arith.mulf %11, %11 : vector<8x256xf32>
    %cst_8 = arith.constant dense<0.000000e+00> : vector<8xf32>
    %17 = vector.multi_reduction <add>, %16, %cst_8 [1] : vector<8x256xf32> to vector<8xf32>
    %18 = vector.shape_cast %17 : vector<8xf32> to vector<8x1xf32>
    %19 = math.sqrt %18 : vector<8x1xf32>
    %20 = arith.subf %15, %19 : vector<8x1xf32>
    %cst_9 = arith.constant 1.000000e+00 : f32
    %21 = vector.broadcast %cst_9 : f32 to vector<8x1xf32>
    %22 = arith.addf %20, %21 : vector<8x1xf32>
    %cst_10 = arith.constant 0.000000e+00 : f32
    %23 = vector.broadcast %cst_10 : f32 to vector<8x1xf32>
    %24 = arith.maximumf %22, %23 : vector<8x1xf32>
    %c3_i32 = arith.constant 3 : i32
    %25 = arith.muli %arg0, %c3_i32 : i32
    %26 = arith.addi %25, %arg1 : i32
    %c2_i32 = arith.constant 2 : i32
    %27 = arith.cmpi eq, %26, %c2_i32 : i32
    %true = arith.constant true
    %28 = arith.xori %27, %true : i1
    %29 = arith.extui %28 : i1 to i32
    %c0_i32_11 = arith.constant 0 : i32
    %30 = arith.cmpi ne, %29, %c0_i32_11 : i32
    scf.if %30 {
      %c0_13 = arith.constant 0 : index
      %c0_14 = arith.constant 0 : index
      %33 = vector.load %arg5[%c0_13, %c0_14] : memref<8x128xf32, #tpu.memory_space<vmem>>, vector<8x128xf32>
      %34 = vector.shape_cast %24 : vector<8x1xf32> to vector<1x8x1xf32>
      %cst_15 = arith.constant dense<0.000000e+00> : vector<1xf32>
      %35 = vector.multi_reduction <add>, %34, %cst_15 [1, 2] : vector<1x8x1xf32> to vector<1xf32>
      %36 = vector.shape_cast %35 : vector<1xf32> to vector<1x1x1xf32>
      %37 = vector.extract %36[0, 0, 0] : f32 from vector<1x1x1xf32>
      %38 = vector.broadcast %37 : f32 to vector<8x128xf32>
      %39 = arith.addf %33, %38 : vector<8x128xf32>
      %c0_16 = arith.constant 0 : index
      %c0_17 = arith.constant 0 : index
      %40 = vector.load %arg5[%c0_16, %c0_17] : memref<8x128xf32, #tpu.memory_space<vmem>>, vector<8x128xf32>
      tpu.vector_store %arg5[%c0_16, %c0_17], %39 {strides = array<i32>} : memref<8x128xf32, #tpu.memory_space<vmem>>, vector<8x128xf32>,
    } else {
    }
    %31 = arith.extui %27 : i1 to i32
    %c0_i32_12 = arith.constant 0 : i32
    %32 = arith.cmpi ne, %31, %c0_i32_12 : i32
    scf.if %32 {
      %c8_i32 = arith.constant 8 : i32
      %33 = arith.muli %26, %c8_i32 : i32
      %34 = tpu.iota {dimensions = array<i32: 0>} : vector<8x1xi32>
      %35 = vector.broadcast %33 : i32 to vector<8x1xi32>
      %36 = arith.addi %35, %34 : vector<8x1xi32>
      %c0_13 = arith.constant 0 : index
      %c0_14 = arith.constant 0 : index
      %37 = vector.load %arg5[%c0_13, %c0_14] : memref<8x128xf32, #tpu.memory_space<vmem>>, vector<8x128xf32>
      %c20_i32 = arith.constant 20 : i32
      %38 = vector.broadcast %c20_i32 : i32 to vector<8x1xi32>
      %39 = arith.cmpi slt, %36, %38 : vector<8x1xi32>
      %cst_15 = arith.constant 0.000000e+00 : f32
      %40 = vector.broadcast %cst_15 : f32 to vector<8x1xf32>
      %41 = arith.select %39, %24, %40 : vector<8x1xi1>, vector<8x1xf32>
      %42 = vector.shape_cast %41 : vector<8x1xf32> to vector<1x8x1xf32>
      %cst_16 = arith.constant dense<0.000000e+00> : vector<1xf32>
      %43 = vector.multi_reduction <add>, %42, %cst_16 [1, 2] : vector<1x8x1xf32> to vector<1xf32>
      %44 = vector.shape_cast %43 : vector<1xf32> to vector<1x1x1xf32>
      %45 = vector.extract %44[0, 0, 0] : f32 from vector<1x1x1xf32>
      %46 = vector.broadcast %45 : f32 to vector<8x128xf32>
      %47 = arith.addf %37, %46 : vector<8x128xf32>
      %c0_17 = arith.constant 0 : index
      %c0_18 = arith.constant 0 : index
      %48 = vector.load %arg5[%c0_17, %c0_18] : memref<8x128xf32, #tpu.memory_space<vmem>>, vector<8x128xf32>
      tpu.vector_store %arg5[%c0_17, %c0_18], %47 {strides = array<i32>} : memref<8x128xf32, #tpu.memory_space<vmem>>, vector<8x128xf32>,
    } else {
    }
    return
  }
  func.func @transform_0(%arg0: i32, %arg1: i32) -> (i32, i32) {
    %c3_i32 = arith.constant 3 : i32
    %0 = arith.muli %arg0, %c3_i32 : i32
    %1 = arith.addi %0, %arg1 : i32
    %c0_i32 = arith.constant 0 : i32
    %c0_i32_0 = arith.constant 0 : i32
    return %1, %c0_i32 : i32, i32
  }
  func.func @transform_1(%arg0: i32, %arg1: i32) -> (i32, i32) {
    %c3_i32 = arith.constant 3 : i32
    %0 = arith.muli %arg0, %c3_i32 : i32
    %1 = arith.addi %0, %arg1 : i32
    %c0_i32 = arith.constant 0 : i32
    %c0_i32_0 = arith.constant 0 : i32
    return %1, %c0_i32 : i32, i32
  }
  func.func @transform_2(%arg0: i32, %arg1: i32) -> (i32, i32) {
    %c3_i32 = arith.constant 3 : i32
    %0 = arith.muli %arg0, %c3_i32 : i32
    %1 = arith.addi %0, %arg1 : i32
    %c0_i32 = arith.constant 0 : i32
    %c0_i32_0 = arith.constant 0 : i32
    return %1, %c0_i32 : i32, i32
  }
  func.func @transform_3(%arg0: i32, %arg1: i32) -> (i32, i32) {
    %c0_i32 = arith.constant 0 : i32
    %c0_i32_0 = arith.constant 0 : i32
    return %arg0, %c0_i32 : i32, i32
  }
}

</mosaic_0001>

<bundles_post_ra>
// kernel: tpu_custom_call.1
= control target key start
LH: loop header
LB: loop body
LE: loop exit
PB: predicated region body
PF: predicated region fallthrough
CT: control target
= control target key end

     0   :  { %s943_s0 = inlined_call_operand.hbm [shape: f32[20,256], index: 0, kind: input, shape index: {}]   ;;  %s944_s1 = inlined_call_operand.hbm [shape: f32[20,256], index: 1, kind: input, shape index: {}]   ;;  %s945_s2 = inlined_call_operand.hbm [shape: f32[20,256], index: 2, kind: input, shape index: {}]   ;;  %s946_s3 = inlined_call_operand.hbm [shape: f32[8,128], index: 3, kind: output, shape index: {}]  }
   0x1   :  { %947 = sst [smem:[#allocation12_spill]] %s944_s1 }
   0x2   :  { %8 = vsyncpa [#allocation3], 0 }
   0x3   :  { %10 = vsyncpa [#allocation3 + $0x1], 0 }
   0x4   :  { %11 = vsyncpa [#allocation6], 0 }
   0x5   :  { %13 = vsyncpa [#allocation6 + $0x1], 0 }
   0x6   :  { %14 = vsyncpa [#allocation4], 0  ;;  %s827_s12 = smov 0   ;;  %s829_s13 = smov 0  }
   0x7   :  { %s831_s14 = smov 0   ;;  %s833_s15 = smov 0  }
   0x8   :  { %s835_s16 = smov 0   ;;  %s837_s17 = smov 0  }
   0x9 LB: > { %s856_s18 = sadd.s32 4294967295, %s803_s17   ;;  %s29_s19 = sadd.s32 1, %s799_s16  ;;  %s803_s17 = sphi %s837_s17, %s20_s17   ;;  %s799_s16 = sphi %s835_s16, %s956_s16   ;;  %s795_s15 = sphi %s833_s15, %s955_s15   ;;  %s791_s14 = sphi %s831_s14, %s954_s14   ;;  %s787_s13 = sphi %s829_s13, %s953_s13   ;;  %s783_s12 = sphi %s827_s12, %s952_s12  }
   0xa   : > { %p30_p0 = scmp.ge.s32.totalorder %s29_s19, 3  ;;  %s43_s20 = sadd.s32 1, %s791_s14 }
   0xb   : > { %p50_p1 = scmp.ne.s32.totalorder %s791_s14, %s787_s13  ;;  %p51_p2 = scmp.eq.s32.totalorder %s803_s17, 0 }
   0xc   : > { %s958_s19 = smov (%p30_p0, %s29_s19), 0  ;;  %p56_p4 = scmp.ne.s32.totalorder %s787_s13, %s783_s12 }
   0xd   : > { %p52_p3 = por %p51_p2, %p50_p1  ;;  %s40_s21 = ssub.s32 %s799_s16, %s958_s19 }
   0xe   : > { %p57_p5 = scmp.eq.s32.totalorder %s856_s18, 0  ;;  %p41_p6 = scmp.eq.s32.totalorder %s40_s21, 0 }
   0xf   : > { %p570_p8 = scmp.lt.s32.totalorder %s803_s17, 3  ;;  %s166_s24 = sand.u32 1, %s791_s14  }
  0x10   : > { %p869_p7 = por %p57_p5, %p56_p4  ;;  %s543_s25 = sshll.u32 %s799_s16, 4 }
  0x11   : > { %s875_s23 = scalar_select %p41_p6, %s791_s14, %s43_s20  }
  0x12   : > { %s522_s26 = sshll.u32 %s166_s24, 4  ;;  %p879_p9 = pnand %p570_p8, %p52_p3 }
  0x13   : > { %s188_s28 = sand.u32 1, %s803_s17   ;;  %s950_s1 = sld [smem:[#allocation12_spill]] }
  0x14   : > { %s192_s5 = scalar_lea.vmem [#allocation5], %s522_s26  ;;  %p531_p10 = scmp.ge.s32.totalorder %s803_s17, 1 }
  0x15   : > { %s203_s6 = sshll.u32 %s192_s5, 4  ;;  %s189_s8 = scalar_lea.sflag [#allocation6], %s188_s28  ;;  %s204_s6 = int_to_ptr.vmem [resolvable:$true] %s203_s6 }
  0x16   : > { %p230_p11 = scmp.lt.s32.totalorder %s803_s17, 4  ;;  %s177_s12 = scalar_lea.hbm %s943_s0, %s543_s25 }
  0x17   : > { %s170_s20 = scalar_lea.vmem [#allocation2], %s522_s26  ;;  %s179_s29 = sshll.u32 %s177_s12, 4  ;;  %s180_s29 = int_to_ptr.hbm [resolvable:$true] %s179_s29 }
  0x18   : > { %p891_p12 = pnand %p531_p10, %p230_p11  ;;  %s181_s21 = sshll.u32 %s170_s20, 4  ;;  %s182_s21 = int_to_ptr.vmem [resolvable:$true] %s181_s21 }
  0x19   : > { %s199_s4 = scalar_lea.hbm %s950_s1, %s543_s25  ;;  %s167_s30 = scalar_lea.sflag [#allocation3], %s166_s24 }
  0x1a   : > { %s201_s7 = sshll.u32 %s199_s4, 4  ;;  %s221_s5 = scalar_lea.hbm %s945_s2, %s543_s25  ;;  %s202_s7 = int_to_ptr.hbm [resolvable:$true] %s201_s7 }
  0x1b   : > { %566 = dma.hbm_to_vmem [thread:$0]  (!%p879_p9), %s202_s7, 256, %s204_s6, %s189_s8  }
  0x1c   : > { %563 = dma.hbm_to_vmem [thread:$0]  (!%p879_p9), %s180_s29, 256, %s182_s21, %s167_s30  }
  0x1d   : > { %s214_s6 = scalar_lea.vmem [#allocation7], %s522_s26  ;;  %s223_s1 = sshll.u32 %s221_s5, 4  ;;  %s224_s1 = int_to_ptr.hbm [resolvable:$true] %s223_s1 }
  0x1e   : > { %s225_s7 = sshll.u32 %s214_s6, 4  ;;  %234 = sbr.rel (%p891_p12) target bundleno = 596 (0x254), region = 32  ;;  %s226_s7 = int_to_ptr.vmem [resolvable:$true] %s225_s7 }
  0x1f   : > { %569 = dma.hbm_to_vmem [thread:$0]  (!%p879_p9), %s224_s1, 256, %s226_s7, %s189_s8  }
  0x20   : > { %s236_s10 = sand.u32 (!%p891_p12), 1, %s787_s13  }
  0x21   : > { %s532_s24 = sshll.u32 (!%p891_p12), %s236_s10, 4  ;;  %s237_s11 = scalar_lea.sflag (!%p891_p12), [#allocation3], %s236_s10 }
  0x22   : > { %s240_s12 = scalar_lea.vmem (!%p891_p12), [#allocation2], %s532_s24 }
  0x23   : > { %770 = dma.done.wait (%p869_p7), %s237_s11, 256  }
  0x24   : > { %772 = vsyncadd (%p869_p7), %s237_s11, 4294967040  ;;  %s246_s25 = sand.u32 1, %s856_s18   ;;  %s250_s27 = scalar_lea.vmem [#allocation5], %s532_s24 }
  0x25   : > { %s247_s26 = scalar_lea.sflag [#allocation6], %s246_s25 }
  0x26   : > { %774 = dma.done.wait (%p869_p7), %s247_s26, 512  }
  0x27   : > { %776 = vsyncadd (%p869_p7), %s247_s26, 4294966784  ;;  %s260_s1 = scalar_lea.vmem [#allocation7], %s532_s24  ;;  %p535_p13 = scmp.ne.s32.totalorder %s795_s15, 0 }
  0x29   : > { %298 = sbr.rel (%p535_p13) target bundleno = 48 (0x30), region = 48 }
  0x2e   : > { %v805_v0 = vmov 0.0  }
  0x2f   : > { %299 = vst [vmem:[#allocation8] sm:$0xff] %v805_v0 }
  0x30 PF: > { %v300_v1 = vld [vmem:[%s240_s12] sm:$0xff]  ;;  %v301_v2 = vld [vmem:[%s240_s12 + $0x8] sm:$0xff]  ;;  %p536_p0 = scmp.eq.s32.totalorder %s795_s15, 2 }
  0x31   : > { %v302_v3 = vld [vmem:[%s250_s27] sm:$0xff]  ;;  %v303_v4 = vld [vmem:[%s250_s27 + $0x8] sm:$0xff] }
  0x32   : > { %v306_v5 = vsub.f32 %v300_v1, %v302_v3  ;;  %v304_v6 = vld [vmem:[%s260_s1] sm:$0xff]  ;;  %v305_v7 = vld [vmem:[%s260_s1 + $0x8] sm:$0xff]  ;;  %v307_v8 = vsub.f32 %v301_v2, %v303_v4 }
  0x33   : > { %v310_v9 = vsub.f32 %v300_v1, %v304_v6  ;;  %v311_v10 = vsub.f32 %v301_v2, %v305_v7 }
  0x34   : > { %v308_v11 = vadd.f32 1e-06, %v306_v5  ;;  %v309_v12 = vadd.f32 1e-06, %v307_v8 }
  0x35   : > { %v312_v15 = vadd.f32 1e-06, %v310_v9  ;;  %v313_v16 = vadd.f32 1e-06, %v311_v10 }
  0x36   : > { %v314_v13 = vmul.f32 %v308_v11, %v308_v11  ;;  %v315_v14 = vmul.f32 %v309_v12, %v309_v12 }
  0x37   : > { %v331_v18 = vmul.f32 %v312_v15, %v312_v15  ;;  %v332_v19 = vmul.f32 %v313_v16, %v313_v16 }
  0x38   : > { %v316_v17 = vadd.f32 %v315_v14, %v314_v13 }
  0x39   : > { %v333_v20 = vadd.f32 %v332_v19, %v331_v18 }
  0x3a   : > { %317 = vadd.xlane.f32.xlu0 %v316_v17 }
  0x42   : > { %334 = vadd.xlane.f32.xlu0 %v333_v20 }
  0xad   : > { %v318_v21 = vpop.xlane.xlu0 %317 }
  0xae   : > { %623 = vrsqrt.f32 %v318_v21  ;;  %vm326_vm0 = vcmp.eq.f32.partialorder %v318_v21, inf  ;;  %v329_v38 = vand.u32 2147483648, %v318_v21  ;;  %vm328_vm2 = vcmp.eq.f32.partialorder %v318_v21, 0.0 }
  0xb4   : > { %v624_v22 = vpop.eup %623 }
  0xb5   : > { %v320_v23 = vmul.f32 %v624_v22, %v318_v21  ;;  %v335_v24 = vpop.xlane.xlu0 %334 }
  0xb6   : > { %625 = vrsqrt.f32 %v335_v24  ;;  %vm343_vm1 = vcmp.eq.f32.partialorder %v335_v24, inf  ;;  %v346_v39 = vand.u32 2147483648, %v335_v24  ;;  %vm345_vm3 = vcmp.eq.f32.partialorder %v335_v24, 0.0 }
  0xb7   : > { %v321_v25 = vmul.f32 %v624_v22, %v320_v23 }
  0xb9   : > { %v322_v26 = vmul.f32 0.5, %v321_v25 }
  0xbb   : > { %v323_v27 = vsub.f32 1.5, %v322_v26 }
  0xbc   : > { %v626_v28 = vpop.eup %625 }
  0xbd   : > { %v337_v29 = vmul.f32 %v626_v28, %v335_v24  ;;  %v324_v30 = vmul.f32 %v624_v22, %v323_v27 }
  0xbf   : > { %v338_v31 = vmul.f32 %v626_v28, %v337_v29  ;;  %v325_v33 = vmul.f32 %v324_v30, %v318_v21 }
  0xc1   : > { %v339_v32 = vmul.f32 0.5, %v338_v31  ;;  %v327_v36 = vsel %vm326_vm0, %v318_v21, %v325_v33 }
  0xc2   : > { %v330_v41 = vsel %vm328_vm2, %v329_v38, %v327_v36 }
  0xc3   : > { %v340_v34 = vsub.f32 1.5, %v339_v32 }
  0xc5   : > { %v341_v35 = vmul.f32 %v626_v28, %v340_v34 }
  0xc7   : > { %v342_v37 = vmul.f32 %v341_v35, %v335_v24 }
  0xc9   : > { %v344_v40 = vsel %vm343_vm1, %v335_v24, %v342_v37 }
  0xca   : > { %v347_v42 = vsel %vm345_vm3, %v346_v39, %v344_v40 }
  0xcb   : > { %v348_v43 = vsub.f32 %v330_v41, %v347_v42  ;;  %357 = sbr.rel (%p536_p0) target bundleno = 392 (0x188), region = 52 }
  0xcd   : > { %v349_v44 = vadd.f32 1.0, %v348_v43 }
  0xcf   : > { %v350_v45 = vmax.f32 %v349_v44, 0.0 }
  0xd0   : > { %vm359_vm4 = vcmask 7168   ;;  %v358_v54 = vld [vmem:[#allocation8] sm:$0xff] }
  0xd1   : > { %v360_v46 = vsel %vm359_vm4, %v350_v45, 0.0 }
  0xd2   : > { %361 = vadd.xlane.f32.xlu0 %v360_v46 }
 0x145   : > { %v362_v47 = vpop.xlane.xlu0 %361 }
 0x146   : > { %v363_v48 = vrot.slane %v362_v47, 4 }
 0x148   : > { %v364_v49 = vadd.f32 %v363_v48, %v362_v47 }
 0x14a   : > { %v365_v50 = vrot.slane %v364_v49, 2 }
 0x14c   : > { %v366_v51 = vadd.f32 %v365_v50, %v364_v49 }
 0x14e   : > { %v367_v52 = vrot.slane %v366_v51, 1 }
 0x150   : > { %v368_v53 = vadd.f32 %v367_v52, %v366_v51 }
 0x152   : > { %546 = vpush %v368_v53 }
 0x183   : > { %s547_s22 = spop %546 }
 0x184   : > { %v370_v55 = vstv %s547_s22 }
 0x185   : > { %v371_v56 = vadd.f32 %v370_v55, %v358_v54 }
 0x187   : > { %372 = vst [vmem:[#allocation8] sm:$0xff] %v371_v56 }
 0x188 PF: > { %p537_p1 = scmp.ne.s32.totalorder %s795_s15, 2 }
 0x189   : > { %s538_s8 = sshll.u32 (!%p537_p1), %s795_s15, 3 }
 0x18a   : > { %375 = sbr.rel (%p537_p1) target bundleno = 590 (0x24e), region = 56 }
 0x18f   : > { %v377_v57 = vlaneseq  ;;  %v379_v58 = vstv %s538_s8  ;;  %vm384_vm5 = vcmask 7168   ;;  %v381_v6 = vld [vmem:[#allocation8] sm:$0xff] }
 0x191   : > { %v378_v59 = vshrl.u32 %v377_v57, 7 }
 0x193   : > { %v380_v60 = vadd.s32 %v379_v58, %v378_v59 }
 0x195   : > { %vm382_vm6 = vcmp.lt.s32.totalorder %v380_v60, 20 }
 0x196   : > { %v383_v61 = vsel %vm382_vm6, %v350_v45, 0.0 }
 0x197   : > { %v385_v62 = vsel %vm384_vm5, %v383_v61, 0.0 }
 0x198   : > { %386 = vadd.xlane.f32.xlu0 %v385_v62 }
 0x20b   : > { %v387_v63 = vpop.xlane.xlu0 %386 }
 0x20c   : > { %v388_v0 = vrot.slane %v387_v63, 4 }
 0x20e   : > { %v389_v1 = vadd.f32 %v388_v0, %v387_v63 }
 0x210   : > { %v390_v2 = vrot.slane %v389_v1, 2 }
 0x212   : > { %v391_v3 = vadd.f32 %v390_v2, %v389_v1 }
 0x214   : > { %v392_v4 = vrot.slane %v391_v3, 1 }
 0x216   : > { %v393_v5 = vadd.f32 %v392_v4, %v391_v3 }
 0x218   : > { %548 = vpush %v393_v5 }
 0x249   : > { %s549_s9 = spop %548 }
 0x24a   : > { %v395_v7 = vstv %s549_s9 }
 0x24b   : > { %v396_v8 = vadd.f32 %v395_v7, %v381_v6 }
 0x24d   : > { %397 = vst [vmem:[#allocation8] sm:$0xff] %v396_v8 }
 0x24e PF: > { %p571_p2 = scmp.eq.s32.totalorder %s856_s18, 2  ;;  %s408_s21 = sshll.u32 %s946_s3, 4  ;;  %s409_s21 = int_to_ptr.hbm [resolvable:$true] %s408_s21 }
 0x24f   : > { %s806_s29 = smov [#allocation8]  }
 0x250   : > { %s406_s30 = sshll.u32 %s806_s29, 4  ;;  %s407_s30 = int_to_ptr.vmem [resolvable:$true] %s406_s30 }
 0x251   : > { %557 = dma.vmem_to_hbm [thread:$0]  (%p571_p2), %s407_s30, 128, %s409_s21, [#allocation4]  }
 0x252   : > { %778 = dma.done.wait (%p571_p2), [#allocation4], 128  }
 0x253   : > { %780 = vsyncadd (%p571_p2), [#allocation4], 4294967168 }
 0x254 PF: > { %s20_s17 = sadd.s32 1, %s803_s17   ;;  %s952_s12 = smov %s787_s13 }
 0x255   : > { %p17_p3 = scmp.ge.s32.totalorder %s20_s17, 5   ;;  %s953_s13 = smov %s791_s14 }
 0x256   : > { %s954_s14 = smov %s875_s23  ;;  %s955_s15 = smov %s799_s16 }
 0x257   : > { %s956_s16 = smov %s958_s19  ;;  %19 = sbr.rel (!%p17_p3) target bundleno = 9 (0x9), region = 106 }
 0x25c   :  { %422 = vsyncpa [#allocation3], 1 }
 0x25d   :  { %424 = vsyncpa [#allocation3 + $0x1], 1 }
 0x25e   :  { %425 = vsyncpa [#allocation6], 1 }
 0x25f   :  { %427 = vsyncpa [#allocation6 + $0x1], 1 }
 0x260   :  { %428 = vsyncpa [#allocation4], 1 }
 0x261   :  { %430 = vsyncpa [#allocation4 + $0x1], 1 }

</bundles_post_ra>
